<compile_context>
chip_gen: v5e
topology: v5e:2x2
jax: 0.10.0
libtpu: 0.0.40
codegen_flags: <defaults>
</compile_context>

<pallas_src>
import jax
import jax.numpy as jnp
from jax.experimental import pallas as pl
from jax.experimental.pallas import tpu as pltpu


def _dma_copy_kernel(x_ref, o_ref, sem):
    # Single HBM->HBM DMA: no VMEM staging, no grid, no per-step pipeline cost.
    cp = pltpu.make_async_copy(x_ref, o_ref, sem)
    cp.start()
    cp.wait()


def _unsqueezed_shape(shape):
    # torch x[:, :, None, None]: insert size-1 dims at positions 2 and 3.
    assert len(shape) >= 2, "nnUnsqueeze expects an input with rank >= 2"
    return tuple(shape[:2]) + (1, 1) + tuple(shape[2:])


def unsqueeze_last2(x: jax.Array, *, materialize: bool = False) -> jax.Array:
    """Equivalent of torch `x[:, :, None, None]`.

    Default: metadata-only reshape (the correct, zero-byte answer for a
    shape-only op).  `materialize=True` forces a fresh output buffer via a
    single HBM->HBM DMA inside a Pallas kernel.
    """
    out_shape = _unsqueezed_shape(x.shape)
    if not materialize:
        return x.reshape(out_shape)

    n_bytes = x.size * jnp.dtype(x.dtype).itemsize
    copied = pl.pallas_call(
        _dma_copy_kernel,
        out_shape=jax.ShapeDtypeStruct(x.shape, x.dtype),
        in_specs=[pl.BlockSpec(memory_space=pl.ANY)],
        out_specs=pl.BlockSpec(memory_space=pl.ANY),
        scratch_shapes=[pltpu.SemaphoreType.DMA(())],
        cost_estimate=pl.CostEstimate(
            flops=0, transcendentals=0, bytes_accessed=2 * n_bytes),
    )(x)
    # Metadata-only reshape to the unsqueezed shape.
    return copied.reshape(out_shape)


if __name__ == "__main__":
    key = jax.random.PRNGKey(0)
    k1, k2 = jax.random.split(key)

    # 1) Canonical nnUnsqueeze usage: (B, C) -> (B, C, 1, 1).
    B, C = 2, 4
    x = jax.random.normal(k1, (B, C), dtype=jnp.float32)

    # Default (zero-copy reshape) path.
    out = unsqueeze_last2(x)
    jax.block_until_ready(out)
    assert out.shape == (B, C, 1, 1), out.shape
    assert out.dtype == x.dtype
    assert jnp.array_equal(out, x[:, :, None, None])

    # Materializing Pallas path (single HBM->HBM DMA) — run the kernel once.
    out_mat = unsqueeze_last2(x, materialize=True)
    jax.block_until_ready(out_mat)
    assert out_mat.shape == (B, C, 1, 1), out_mat.shape
    assert out_mat.dtype == x.dtype
    assert jnp.array_equal(out_mat, x[:, :, None, None])

    # 2) Higher-rank input, same semantics: (2, 4, 16, 16) -> (2, 4, 1, 1, 16, 16).
    x4 = jax.random.normal(k2, (2, 4, 16, 16), dtype=jnp.float32)
    out4 = unsqueeze_last2(x4, materialize=True)
    jax.block_until_ready(out4)
    assert out4.shape == (2, 4, 1, 1, 16, 16), out4.shape
    assert jnp.array_equal(out4, x4[:, :, None, None])

    print("KERNEL_OK")
</pallas_src>

<mosaic_0001>
module attributes {stable_mosaic.version = 11 : i64} {
  func.func @_dma_copy_kernel(%arg0: memref<2x4xf32, #tpu.memory_space<any>>, %arg1: memref<2x4xf32, #tpu.memory_space<any>>, %arg2: memref<!tpu.dma_semaphore, #tpu.memory_space<semaphore_mem>>) attributes {dimension_semantics = [], scalar_prefetch = 0 : i64, scratch_operands = 1 : i64, tpu.core_type = #tpu.core_type<tc>} {
    tpu.enqueue_dma source(%arg0 : memref<2x4xf32, #tpu.memory_space<any>>) target(%arg1 : memref<2x4xf32, #tpu.memory_space<any>>) target_semaphore(%arg2 : memref<!tpu.dma_semaphore, #tpu.memory_space<semaphore_mem>>)
    tpu.wait_dma2 semaphore(%arg2 : memref<!tpu.dma_semaphore, #tpu.memory_space<semaphore_mem>>) src(%arg0 : memref<2x4xf32, #tpu.memory_space<any>>) dst(%arg1 : memref<2x4xf32, #tpu.memory_space<any>>)
    return
  }
}

</mosaic_0001>

<bundles_post_ra>
// kernel: tpu_custom_call.1
= control target key start
LH: loop header
LB: loop body
LE: loop exit
PB: predicated region body
PF: predicated region fallthrough
CT: control target
= control target key end

     0   :  { %s32_s12 = smov [#allocation2]   ;;  %s33_s13 = smov [#allocation3]   ;;  %s51_s0 = inlined_call_operand.hbm [shape: f32[2,4], index: 0, kind: input, shape index: {}]   ;;  %s52_s1 = inlined_call_operand.hbm [shape: f32[2,4], index: 1, kind: output, shape index: {}]  }
   0x1   :  { %s10_s8 = sshll.u32 %s51_s0, 4  ;;  %s12_s11 = sshll.u32 %s52_s1, 4  ;;  %s11_s8 = int_to_ptr.hbm [resolvable:$true] %s10_s8  ;;  %s13_s11 = int_to_ptr.hbm [resolvable:$true] %s12_s11 }
   0x2   :  { %s34_s14 = smov 0  }
   0x3   :  { %16 = dma.general %s11_s8, 32, %s13_s11, %s32_s12, %s33_s13, [#allocation4], %s34_s14, 0  }
   0x4   :  { %30 = dma.done.wait [#allocation2], 32 }
   0x5   :  { %31 = vsyncadd [#allocation2], 4294967264 }
   0x6   :  { %20 = vsyncmov [#allocation2] }
   0x9   :  { %s21_s15 = vpop.sfrf %20 }
   0xa   :  { %p26_p0 = scmp.ne.s32.totalorder %s21_s15, 0 }
   0xc   :  { %25 = shalt.err (%p26_p0)  }

</bundles_post_ra>
